<compile_context>
chip_gen: v6e
topology: v6e:2x2x1
jax: 0.10.0
libtpu: 0.0.40
codegen_flags: <defaults>
</compile_context>

<pallas_src>
import jax
import jax.numpy as jnp
from jax.experimental import pallas as pl
from jax.experimental.pallas import tpu as pltpu

# Problem sizes implied by the module (small test shapes).
B, C, Hs, Ws = 2, 4, 16, 16
D = C * Hs * Ws          # 1024 flattened features (already a multiple of 128)
HID = 32                 # true encoder/decoder hidden width
LAT = 16                 # true latent dim

# TPU-friendly padded widths (128-lane dense intermediates & outputs).
HID_P = 128
LAT_P = 128
HEADS_P = 2 * LAT_P      # fused (mu | logvar) head width (mu: lanes [0,128), logvar: [128,256))

TM_MAX = 512             # cap so double-buffered tiles stay well under scoped VMEM


def _round_up(n, m):
    return ((n + m - 1) // m) * m


def _pick_tm(b):
    """Row tile: big enough for MXU M-utilization, small enough for >=2 grid steps
    (v7x megacore) when the batch allows it. Multiple of 16 for bf16 sublane packing."""
    tm = _round_up(pl.cdiv(b, 2), 16)
    return max(16, min(TM_MAX, tm))


def vae_kernel(x_ref, eps_ref,
               we1_ref, be1_ref,       # encoder hidden       (bf16 W, f32 b)
               wh_ref, bh_ref,         # fused mu|logvar head (bf16 W, f32 b)
               wd1_ref, bd1_ref,       # decoder hidden       (bf16 W, f32 b)
               wd2_ref, bd2_ref,       # decoder output       (bf16 W, f32 b)
               recons_ref, mulv_ref):
    # ---- encoder ----  x read as f32, cast on-chip; bf16 x bf16 matmul, f32 accumulation
    x = x_ref[...].astype(jnp.bfloat16)
    h = jnp.dot(x, we1_ref[...], preferred_element_type=jnp.float32) + be1_ref[...]
    h = jnp.maximum(h, 0.0)

    # ---- fused (mu | logvar) heads: one MXU pass, lane-dense ----
    ml = jnp.dot(h.astype(jnp.bfloat16), wh_ref[...],
                 preferred_element_type=jnp.float32) + bh_ref[...]
    mu = ml[:, :LAT_P]        # slices at vreg (128-lane) boundaries: free
    logvar = ml[:, LAT_P:]

    # ---- distribution.rsample()  (reparameterization trick) ----
    # eps lanes >= LAT are zero, so padded latent lanes stay exactly zero and the
    # zero-padded rows of wd1 keep them inert.
    z = mu + jnp.exp(0.5 * logvar) * eps_ref[...]

    # ---- decoder ----
    hd = jnp.dot(z.astype(jnp.bfloat16), wd1_ref[...],
                 preferred_element_type=jnp.float32) + bd1_ref[...]
    hd = jnp.maximum(hd, 0.0)
    recons = jnp.dot(hd.astype(jnp.bfloat16), wd2_ref[...],
                     preferred_element_type=jnp.float32) + bd2_ref[...]

    # bf16 stores: halve the dominant HBM writeback streams (compute stayed f32).
    recons_ref[...] = recons.astype(recons_ref.dtype)
    mulv_ref[...] = ml.astype(mulv_ref.dtype)


def init_params(key):
    """Unpadded f32 parameters (also used by the pure-JAX reference)."""
    ks = jax.random.split(key, 5)

    def lin(k, fan_in, fan_out):
        w = jax.random.normal(k, (fan_in, fan_out), jnp.float32) / jnp.sqrt(fan_in)
        b = jnp.zeros((fan_out,), jnp.float32)
        return w, b

    we1, be1 = lin(ks[0], D, HID)
    wmu, bmu = lin(ks[1], HID, LAT)
    wlv, blv = lin(ks[2], HID, LAT)
    wd1, bd1 = lin(ks[3], LAT, HID)
    wd2, bd2 = lin(ks[4], HID, D)
    return dict(we1=we1, be1=be1, wmu=wmu, bmu=bmu, wlv=wlv, blv=blv,
                wd1=wd1, bd1=bd1, wd2=wd2, bd2=bd2)


def pad_params(p):
    """Zero-pad to 128-lane widths, fuse the two heads, bf16 weights (f32 biases)."""
    we1 = (jnp.zeros((D, HID_P), jnp.float32)
           .at[:, :HID].set(p["we1"]).astype(jnp.bfloat16))
    be1 = jnp.zeros((1, HID_P), jnp.float32).at[0, :HID].set(p["be1"])

    wh = (jnp.zeros((HID_P, HEADS_P), jnp.float32)
          .at[:HID, :LAT].set(p["wmu"])
          .at[:HID, LAT_P:LAT_P + LAT].set(p["wlv"]).astype(jnp.bfloat16))
    bh = (jnp.zeros((1, HEADS_P), jnp.float32)
          .at[0, :LAT].set(p["bmu"])
          .at[0, LAT_P:LAT_P + LAT].set(p["blv"]))

    wd1 = (jnp.zeros((LAT_P, HID_P), jnp.float32)
           .at[:LAT, :HID].set(p["wd1"]).astype(jnp.bfloat16))
    bd1 = jnp.zeros((1, HID_P), jnp.float32).at[0, :HID].set(p["bd1"])

    wd2 = (jnp.zeros((HID_P, D), jnp.float32)
           .at[:HID, :].set(p["wd2"]).astype(jnp.bfloat16))
    bd2 = p["bd2"].reshape(1, D)
    return (we1, be1, wh, bh, wd1, bd1, wd2, bd2)


@jax.jit
def vae_forward(data_nchw, eps, kernel_params):
    b = data_nchw.shape[0]
    tm = _pick_tm(b)
    grid = (pl.cdiv(b, tm),)

    # data.to(torch.float32); the reshape is metadata-only and the kernel reads the
    # f32 rows directly (bf16 cast happens on-chip) -> no extra wrapper pass over x.
    x = data_nchw.astype(jnp.float32).reshape(b, D)
    # Reparameterization noise placed in the first LAT of LAT_P lanes; zero lanes keep
    # the padded latent dims inert. (Tiny array; ~10x smaller than the x stream.)
    eps_p = jnp.zeros((b, LAT_P), jnp.float32).at[:, :LAT].set(eps.astype(jnp.float32))

    row = lambda i: (i, 0)      # streamed per-row-tile arrays (x, eps, outputs)
    rep = lambda i: (0, 0)      # VMEM-resident weights/biases

    recons_flat, mulv = pl.pallas_call(
        vae_kernel,
        grid=grid,
        in_specs=[
            pl.BlockSpec((tm, D), row),            # x (f32, partial edge tile masked)
            pl.BlockSpec((tm, LAT_P), row),        # eps
            pl.BlockSpec((D, HID_P), rep), pl.BlockSpec((1, HID_P), rep),
            pl.BlockSpec((HID_P, HEADS_P), rep), pl.BlockSpec((1, HEADS_P), rep),
            pl.BlockSpec((LAT_P, HID_P), rep), pl.BlockSpec((1, HID_P), rep),
            pl.BlockSpec((HID_P, D), rep), pl.BlockSpec((1, D), rep),
        ],
        out_specs=(
            pl.BlockSpec((tm, D), row),            # recons (bf16)
            pl.BlockSpec((tm, HEADS_P), row),      # fused (mu | logvar) (bf16)
        ),
        out_shape=(
            jax.ShapeDtypeStruct((b, D), jnp.bfloat16),
            jax.ShapeDtypeStruct((b, HEADS_P), jnp.bfloat16),
        ),
        compiler_params=pltpu.CompilerParams(
            dimension_semantics=("parallel",)),
    )(x, eps_p, *kernel_params)

    recons = recons_flat.reshape((b,) + data_nchw.shape[1:])
    mu = mulv[:, :LAT].astype(jnp.float32)
    logvar = mulv[:, LAT_P:LAT_P + LAT].astype(jnp.float32)
    return recons, (mu, logvar)


def vae_reference(data_nchw, eps, p):
    """Pure-JAX f32 reference of the same forward pass."""
    b = data_nchw.shape[0]
    x = data_nchw.astype(jnp.float32).reshape(b, D)
    h = jnp.maximum(x @ p["we1"] + p["be1"], 0.0)
    mu = h @ p["wmu"] + p["bmu"]
    logvar = h @ p["wlv"] + p["blv"]
    z = mu + jnp.exp(0.5 * logvar) * eps
    hd = jnp.maximum(z @ p["wd1"] + p["bd1"], 0.0)
    recons = hd @ p["wd2"] + p["bd2"]
    return recons.reshape(data_nchw.shape), mu, logvar


if __name__ == "__main__":
    key = jax.random.PRNGKey(0)
    k_data, k_eps, k_params = jax.random.split(key, 3)

    data = jax.random.normal(k_data, (B, C, Hs, Ws), jnp.float32)
    # Explicit reparameterization noise (deterministic stand-in for dist.rsample's RNG).
    eps = jax.random.normal(k_eps, (B, LAT), jnp.float32)

    params = init_params(k_params)
    kparams = pad_params(params)

    recons, (mu, logvar) = vae_forward(data, eps, kparams)
    jax.block_until_ready((recons, mu, logvar))

    assert recons.shape == (B, C, Hs, Ws)
    assert mu.shape == (B, LAT) and logvar.shape == (B, LAT)

    # Correctness vs. f32 reference (tolerances cover bf16 weight/activation/output storage).
    r_ref, mu_ref, lv_ref = vae_reference(data, eps, params)
    assert jnp.allclose(mu, mu_ref, atol=5e-2, rtol=5e-2)
    assert jnp.allclose(logvar, lv_ref, atol=5e-2, rtol=5e-2)
    assert jnp.allclose(recons.astype(jnp.float32), r_ref, atol=1e-1, rtol=1e-1)

    print("KERNEL_OK")
</pallas_src>

<mosaic_0001>
module attributes {stable_mosaic.version = 11 : i64} {
  func.func @vae_kernel(%arg0: i32, %arg1: memref<16x1024xf32, #tpu.memory_space<vmem>>, %arg2: memref<16x128xf32, #tpu.memory_space<vmem>>, %arg3: memref<1024x128xbf16, #tpu.memory_space<vmem>>, %arg4: memref<1x128xf32, #tpu.memory_space<vmem>>, %arg5: memref<128x256xbf16, #tpu.memory_space<vmem>>, %arg6: memref<1x256xf32, #tpu.memory_space<vmem>>, %arg7: memref<128x128xbf16, #tpu.memory_space<vmem>>, %arg8: memref<1x128xf32, #tpu.memory_space<vmem>>, %arg9: memref<128x1024xbf16, #tpu.memory_space<vmem>>, %arg10: memref<1x1024xf32, #tpu.memory_space<vmem>>, %arg11: memref<16x1024xbf16, #tpu.memory_space<vmem>>, %arg12: memref<16x256xbf16, #tpu.memory_space<vmem>>) attributes {dimension_semantics = [#tpu.dimension_semantics<parallel>], iteration_bounds = array<i64: 1>, scalar_prefetch = 0 : i64, scratch_operands = 0 : i64, tpu.core_type = #tpu.core_type<tc>, window_params = [{transform_indices = @transform_0, window_bounds = array<i64: 16, 1024>}, {transform_indices = @transform_1, window_bounds = array<i64: 16, 128>}, {pipeline_mode = #tpu.pipeline_mode<synchronous>, transform_indices = @transform_2, window_bounds = array<i64: 1024, 128>}, {pipeline_mode = #tpu.pipeline_mode<synchronous>, transform_indices = @transform_3, window_bounds = array<i64: 1, 128>}, {pipeline_mode = #tpu.pipeline_mode<synchronous>, transform_indices = @transform_4, window_bounds = array<i64: 128, 256>}, {pipeline_mode = #tpu.pipeline_mode<synchronous>, transform_indices = @transform_5, window_bounds = array<i64: 1, 256>}, {pipeline_mode = #tpu.pipeline_mode<synchronous>, transform_indices = @transform_6, window_bounds = array<i64: 128, 128>}, {pipeline_mode = #tpu.pipeline_mode<synchronous>, transform_indices = @transform_7, window_bounds = array<i64: 1, 128>}, {pipeline_mode = #tpu.pipeline_mode<synchronous>, transform_indices = @transform_8, window_bounds = array<i64: 128, 1024>}, {pipeline_mode = #tpu.pipeline_mode<synchronous>, transform_indices = @transform_9, window_bounds = array<i64: 1, 1024>}, {transform_indices = @transform_10, window_bounds = array<i64: 16, 1024>}, {transform_indices = @transform_11, window_bounds = array<i64: 16, 256>}]} {
    %c0 = arith.constant 0 : index
    %c0_0 = arith.constant 0 : index
    %0 = vector.load %arg1[%c0, %c0_0] : memref<16x1024xf32, #tpu.memory_space<vmem>>, vector<16x1024xf32>
    %1 = arith.truncf %0 : vector<16x1024xf32> to vector<16x1024xbf16>
    %c0_1 = arith.constant 0 : index
    %c0_2 = arith.constant 0 : index
    %2 = vector.load %arg3[%c0_1, %c0_2] : memref<1024x128xbf16, #tpu.memory_space<vmem>>, vector<1024x128xbf16>
    %cst = arith.constant dense<0.000000e+00> : vector<16x128xf32>
    %3 = tpu.matmul %1, %2, %cst {dimension_numbers = #tpu.dot_dimension_numbers<[1], [0], [0], [1], [0, 0, 1, 1], [], []>} : vector<16x1024xbf16>, vector<1024x128xbf16>, vector<16x128xf32> -> vector<16x128xf32>
    %c0_3 = arith.constant 0 : index
    %c0_4 = arith.constant 0 : index
    %4 = vector.load %arg4[%c0_3, %c0_4] : memref<1x128xf32, #tpu.memory_space<vmem>>, vector<1x128xf32>
    %5 = vector.broadcast %4 : vector<1x128xf32> to vector<16x128xf32>
    %6 = arith.addf %3, %5 : vector<16x128xf32>
    %cst_5 = arith.constant 0.000000e+00 : f32
    %7 = vector.broadcast %cst_5 : f32 to vector<16x128xf32>
    %8 = arith.maximumf %6, %7 : vector<16x128xf32>
    %9 = arith.truncf %8 : vector<16x128xf32> to vector<16x128xbf16>
    %c0_6 = arith.constant 0 : index
    %c0_7 = arith.constant 0 : index
    %10 = vector.load %arg5[%c0_6, %c0_7] : memref<128x256xbf16, #tpu.memory_space<vmem>>, vector<128x256xbf16>
    %cst_8 = arith.constant dense<0.000000e+00> : vector<16x256xf32>
    %11 = tpu.matmul %9, %10, %cst_8 {dimension_numbers = #tpu.dot_dimension_numbers<[1], [0], [0], [1], [0, 0, 1, 1], [], []>} : vector<16x128xbf16>, vector<128x256xbf16>, vector<16x256xf32> -> vector<16x256xf32>
    %c0_9 = arith.constant 0 : index
    %c0_10 = arith.constant 0 : index
    %12 = vector.load %arg6[%c0_9, %c0_10] : memref<1x256xf32, #tpu.memory_space<vmem>>, vector<1x256xf32>
    %13 = vector.broadcast %12 : vector<1x256xf32> to vector<16x256xf32>
    %14 = arith.addf %11, %13 : vector<16x256xf32>
    %15 = vector.extract_strided_slice %14 {offsets = [0, 0], sizes = [16, 128], strides = [1, 1]} : vector<16x256xf32> to vector<16x128xf32>
    %16 = vector.extract_strided_slice %14 {offsets = [0, 128], sizes = [16, 128], strides = [1, 1]} : vector<16x256xf32> to vector<16x128xf32>
    %cst_11 = arith.constant 5.000000e-01 : f32
    %17 = vector.broadcast %cst_11 : f32 to vector<16x128xf32>
    %18 = arith.mulf %17, %16 : vector<16x128xf32>
    %19 = math.exp %18 : vector<16x128xf32>
    %c0_12 = arith.constant 0 : index
    %c0_13 = arith.constant 0 : index
    %20 = vector.load %arg2[%c0_12, %c0_13] : memref<16x128xf32, #tpu.memory_space<vmem>>, vector<16x128xf32>
    %21 = arith.mulf %19, %20 : vector<16x128xf32>
    %22 = arith.addf %15, %21 : vector<16x128xf32>
    %23 = arith.truncf %22 : vector<16x128xf32> to vector<16x128xbf16>
    %c0_14 = arith.constant 0 : index
    %c0_15 = arith.constant 0 : index
    %24 = vector.load %arg7[%c0_14, %c0_15] : memref<128x128xbf16, #tpu.memory_space<vmem>>, vector<128x128xbf16>
    %cst_16 = arith.constant dense<0.000000e+00> : vector<16x128xf32>
    %25 = tpu.matmul %23, %24, %cst_16 {dimension_numbers = #tpu.dot_dimension_numbers<[1], [0], [0], [1], [0, 0, 1, 1], [], []>} : vector<16x128xbf16>, vector<128x128xbf16>, vector<16x128xf32> -> vector<16x128xf32>
    %c0_17 = arith.constant 0 : index
    %c0_18 = arith.constant 0 : index
    %26 = vector.load %arg8[%c0_17, %c0_18] : memref<1x128xf32, #tpu.memory_space<vmem>>, vector<1x128xf32>
    %27 = vector.broadcast %26 : vector<1x128xf32> to vector<16x128xf32>
    %28 = arith.addf %25, %27 : vector<16x128xf32>
    %cst_19 = arith.constant 0.000000e+00 : f32
    %29 = vector.broadcast %cst_19 : f32 to vector<16x128xf32>
    %30 = arith.maximumf %28, %29 : vector<16x128xf32>
    %31 = arith.truncf %30 : vector<16x128xf32> to vector<16x128xbf16>
    %c0_20 = arith.constant 0 : index
    %c0_21 = arith.constant 0 : index
    %32 = vector.load %arg9[%c0_20, %c0_21] : memref<128x1024xbf16, #tpu.memory_space<vmem>>, vector<128x1024xbf16>
    %cst_22 = arith.constant dense<0.000000e+00> : vector<16x1024xf32>
    %33 = tpu.matmul %31, %32, %cst_22 {dimension_numbers = #tpu.dot_dimension_numbers<[1], [0], [0], [1], [0, 0, 1, 1], [], []>} : vector<16x128xbf16>, vector<128x1024xbf16>, vector<16x1024xf32> -> vector<16x1024xf32>
    %c0_23 = arith.constant 0 : index
    %c0_24 = arith.constant 0 : index
    %34 = vector.load %arg10[%c0_23, %c0_24] : memref<1x1024xf32, #tpu.memory_space<vmem>>, vector<1x1024xf32>
    %35 = vector.broadcast %34 : vector<1x1024xf32> to vector<16x1024xf32>
    %36 = arith.addf %33, %35 : vector<16x1024xf32>
    %37 = arith.truncf %36 : vector<16x1024xf32> to vector<16x1024xbf16>
    %c0_25 = arith.constant 0 : index
    %c0_26 = arith.constant 0 : index
    %38 = vector.load %arg11[%c0_25, %c0_26] : memref<16x1024xbf16, #tpu.memory_space<vmem>>, vector<16x1024xbf16>
    tpu.vector_store %arg11[%c0_25, %c0_26], %37 {strides = array<i32>} : memref<16x1024xbf16, #tpu.memory_space<vmem>>, vector<16x1024xbf16>,
    %39 = arith.truncf %14 : vector<16x256xf32> to vector<16x256xbf16>
    %c0_27 = arith.constant 0 : index
    %c0_28 = arith.constant 0 : index
    %40 = vector.load %arg12[%c0_27, %c0_28] : memref<16x256xbf16, #tpu.memory_space<vmem>>, vector<16x256xbf16>
    tpu.vector_store %arg12[%c0_27, %c0_28], %39 {strides = array<i32>} : memref<16x256xbf16, #tpu.memory_space<vmem>>, vector<16x256xbf16>,
    return
  }
  func.func @transform_0(%arg0: i32) -> (i32, i32) {
    %c0_i32 = arith.constant 0 : i32
    %c0_i32_0 = arith.constant 0 : i32
    return %arg0, %c0_i32 : i32, i32
  }
  func.func @transform_1(%arg0: i32) -> (i32, i32) {
    %c0_i32 = arith.constant 0 : i32
    %c0_i32_0 = arith.constant 0 : i32
    return %arg0, %c0_i32 : i32, i32
  }
  func.func @transform_2(%arg0: i32) -> (i32, i32) {
    %c0_i32 = arith.constant 0 : i32
    %c0_i32_0 = arith.constant 0 : i32
    %c0_i32_1 = arith.constant 0 : i32
    return %c0_i32, %c0_i32_0 : i32, i32
  }
  func.func @transform_3(%arg0: i32) -> (i32, i32) {
    %c0_i32 = arith.constant 0 : i32
    %c0_i32_0 = arith.constant 0 : i32
    %c0_i32_1 = arith.constant 0 : i32
    return %c0_i32, %c0_i32_0 : i32, i32
  }
  func.func @transform_4(%arg0: i32) -> (i32, i32) {
    %c0_i32 = arith.constant 0 : i32
    %c0_i32_0 = arith.constant 0 : i32
    %c0_i32_1 = arith.constant 0 : i32
    return %c0_i32, %c0_i32_0 : i32, i32
  }
  func.func @transform_5(%arg0: i32) -> (i32, i32) {
    %c0_i32 = arith.constant 0 : i32
    %c0_i32_0 = arith.constant 0 : i32
    %c0_i32_1 = arith.constant 0 : i32
    return %c0_i32, %c0_i32_0 : i32, i32
  }
  func.func @transform_6(%arg0: i32) -> (i32, i32) {
    %c0_i32 = arith.constant 0 : i32
    %c0_i32_0 = arith.constant 0 : i32
    %c0_i32_1 = arith.constant 0 : i32
    return %c0_i32, %c0_i32_0 : i32, i32
  }
  func.func @transform_7(%arg0: i32) -> (i32, i32) {
    %c0_i32 = arith.constant 0 : i32
    %c0_i32_0 = arith.constant 0 : i32
    %c0_i32_1 = arith.constant 0 : i32
    return %c0_i32, %c0_i32_0 : i32, i32
  }
  func.func @transform_8(%arg0: i32) -> (i32, i32) {
    %c0_i32 = arith.constant 0 : i32
    %c0_i32_0 = arith.constant 0 : i32
    %c0_i32_1 = arith.constant 0 : i32
    return %c0_i32, %c0_i32_0 : i32, i32
  }
  func.func @transform_9(%arg0: i32) -> (i32, i32) {
    %c0_i32 = arith.constant 0 : i32
    %c0_i32_0 = arith.constant 0 : i32
    %c0_i32_1 = arith.constant 0 : i32
    return %c0_i32, %c0_i32_0 : i32, i32
  }
  func.func @transform_10(%arg0: i32) -> (i32, i32) {
    %c0_i32 = arith.constant 0 : i32
    %c0_i32_0 = arith.constant 0 : i32
    return %arg0, %c0_i32 : i32, i32
  }
  func.func @transform_11(%arg0: i32) -> (i32, i32) {
    %c0_i32 = arith.constant 0 : i32
    %c0_i32_0 = arith.constant 0 : i32
    return %arg0, %c0_i32 : i32, i32
  }
}

</mosaic_0001>

<bundles_post_ra>
// kernel: vae_forward.1
= control target key start
LH: loop header
LB: loop body
LE: loop exit
PB: predicated region body
PF: predicated region fallthrough
CT: control target
= control target key end

     0   :  { %17 = vsyncpa [#allocation3], 0  ;;  %s2919_s0 = inlined_call_operand.vmem [shape: f32[2,1024], index: 0, kind: input, shape index: {}]   ;;  %s2920_s1 = inlined_call_operand.vmem [shape: f32[2,128], index: 1, kind: input, shape index: {}]   ;;  %s2921_s2 = inlined_call_operand.hbm [shape: bf16[1024,128], index: 2, kind: input, shape index: {}]   ;;  %s2922_s3 = inlined_call_operand.vmem [shape: f32[1,128], index: 3, kind: input, shape index: {}]   ;;  %s2923_s4 = inlined_call_operand.vmem [shape: bf16[128,256], index: 4, kind: input, shape index: {}]   ;;  %s2924_s5 = inlined_call_operand.vmem [shape: f32[1,256], index: 5, kind: input, shape index: {}]   ;;  %s2925_s6 = inlined_call_operand.hbm [shape: bf16[128,128], index: 6, kind: input, shape index: {}]   ;;  %s2926_s7 = inlined_call_operand.vmem [shape: f32[1,128], index: 7, kind: input, shape index: {}]   ;;  %s2927_s8 = inlined_call_operand.hbm [shape: bf16[128,1024], index: 8, kind: input, shape index: {}]   ;;  %s2928_s9 = inlined_call_operand.vmem [shape: f32[1,1024], index: 9, kind: input, shape index: {}]   ;;  %s2929_s10 = inlined_call_operand.vmem [shape: bf16[2,1024], index: 10, kind: output, shape index: {0}]   ;;  %s2930_s11 = inlined_call_operand.vmem [shape: bf16[2,256], index: 11, kind: output, shape index: {1}]  }
   0x1   :  { %18 = vsyncpa [#allocation5], 0  ;;  %s2649_s17 = smov [#allocation4]   ;;  %s2650_s19 = smov [#allocation2]  }
   0x2   :  { %s46_s18 = sshll.u32 %s2649_s17, 4  ;;  %s28_s20 = sshll.u32 %s2650_s19, 4  ;;  %s47_s18 = int_to_ptr.vmem [resolvable:$true] %s46_s18  ;;  %s29_s20 = int_to_ptr.vmem [resolvable:$true] %s28_s20 }
   0x3   :  { %s2593_s21 = scalar_lea.vmem %s47_s18, 1024  ;;  %p2598_p1 = scmp.lt.s32.totalorder %s47_s18, %s47_s18 }
   0x4   :  { %p2594_p0 = scmp.ne.s32.totalorder %s47_s18, %s2593_s21  ;;  %p2599_p2 = scmp.lt.s32.totalorder %s2593_s21, %s2593_s21 }
   0x6   :  { %p2600_p3 = por %p2599_p2, %p2598_p1 }
   0x8   :  { %p2601_p4 = pnand %p2600_p3, %p2594_p0 }
   0xa   :  { %2604 = shalt.err (!%p2601_p4)
}
   0xb   :  { %s2651_s22 = smov 64   ;;  %s2652_s23 = smov 4  }
   0xc   :  { %52 = dma.hbm_to_vmem [thread:$0]  %s2925_s6, 1024, %s47_s18, [#allocation5], %s2651_s22, %s2651_s22, %s2652_s23  }
   0xd   :  { %s2613_s26 = scalar_lea.vmem %s29_s20, 8192  ;;  %p2618_p6 = scmp.lt.s32.totalorder %s29_s20, %s29_s20 }
   0xe   :  { %p2614_p5 = scmp.ne.s32.totalorder %s29_s20, %s2613_s26  ;;  %p2619_p7 = scmp.lt.s32.totalorder %s2613_s26, %s2613_s26 }
  0x10   :  { %p2620_p8 = por %p2619_p7, %p2618_p6 }
  0x12   :  { %p2621_p9 = pnand %p2620_p8, %p2614_p5 }
  0x14   :  { %2624 = shalt.err (!%p2621_p9)
}
  0x15   :  { %34 = dma.hbm_to_vmem [thread:$0]  %s2921_s2, 8192, %s29_s20, [#allocation3], %s2651_s22, %s2651_s22, %s2652_s23  }
  0x16   :  { %s2653_s29 = smov [#allocation6]  }
  0x17   :  { %s60_s30 = sshll.u32 %s2653_s29, 4  ;;  %s61_s30 = int_to_ptr.vmem [resolvable:$true] %s60_s30 }
  0x18   :  { %s2633_s12 = scalar_lea.vmem %s61_s30, 8192  ;;  %p2638_p11 = scmp.lt.s32.totalorder %s61_s30, %s61_s30 }
  0x19   :  { %p2634_p10 = scmp.ne.s32.totalorder %s61_s30, %s2633_s12  ;;  %p2639_p12 = scmp.lt.s32.totalorder %s2633_s12, %s2633_s12 }
  0x1b   :  { %p2640_p13 = por %p2639_p12, %p2638_p11 }
  0x1d   :  { %p2641_p0 = pnand %p2640_p13, %p2634_p10 }
  0x1f   :  { %2644 = shalt.err (!%p2641_p0)
}
  0x20   :  { %s2654_s6 = smov 512   ;;  %s2655_s13 = smov 32  }
  0x21   :  { %66 = dma.hbm_to_vmem [thread:$0]  %s2927_s8, 8192, %s61_s30, [#allocation5], %s2654_s6, %s2654_s6, %s2655_s13  }
  0x22   :  { %2645 = dma.done.wait [#allocation3], 8192  }
  0x23   :  { %2646 = vsyncadd [#allocation3], 4294959104 }
  0x24   :  { %2647 = dma.done.wait [#allocation5], 9216  }
  0x25   :  { %2648 = vsyncadd [#allocation5], 4294958080  ;;  %v2461_v0 = vld [vmem:[#allocation2 + $0x78] sm:$0xff]   ;;  %v2465_v4 = vld [vmem:[#allocation2 + $0x70] sm:$0xff]   ;;  %v2656_v25 = vmov 1983009808   ;;  %v118_v27 = vlaneseq }
  0x26   :  { %v2462_v1 = vld [vmem:[#allocation2 + $0xf8] sm:$0xff]   ;;  %2332 = vmatprep.subr.bf16.mxu0 %v2461_v0  ;;  %v2466_v5 = vld [vmem:[#allocation2 + $0xf0] sm:$0xff]   ;;  %v2469_v8 = vld [vmem:[#allocation2 + $0x68] sm:$0xff]   ;;  %v116_v26 = vunpack.c.l.s4 %v2656_v25  ;;  %vm2659_vm0 = vmmov 0  }
  0x27   :  { %v2463_v2 = vld [vmem:[#allocation2 + $0x38] sm:$0xff]   ;;  %2354 = vmatprep.subr.bf16.mxu1 %v2462_v1  ;;  %v2467_v6 = vld [vmem:[#allocation2 + $0x30] sm:$0xff]   ;;  %v2470_v9 = vld [vmem:[#allocation2 + $0xe8] sm:$0xff]   ;;  %v2730_v33 = vshrl.u32 %v118_v27, 7 }
  0x28   :  { %v2464_v3 = vld [vmem:[#allocation2 + $0xb8] sm:$0xff]   ;;  %2333 = vmatpush3.bf16.msra.mxu0 %v2463_v2  ;;  %v2468_v7 = vld [vmem:[#allocation2 + $0xb0] sm:$0xff]   ;;  %v2471_v10 = vld [vmem:[#allocation2 + $0x28] sm:$0xff]   ;;  %v117_v32 = vunpack.c.0.s8 %v116_v26 }
  0x29   :  { %2355 = vmatpush3.bf16.msra.mxu1 %v2464_v3  ;;  %2334 = vmatprep.subr.bf16.mxu0 %v2465_v4  ;;  %v2472_v11 = vld [vmem:[#allocation2 + $0xa8] sm:$0xff]   ;;  %v2473_v12 = vld [vmem:[#allocation2 + $0x60] sm:$0xff]   ;;  %v2477_v16 = vld [vmem:[#allocation2 + $0x58] sm:$0xff]  }
  0x2a   :  { %2356 = vmatprep.subr.bf16.mxu1 %v2466_v5  ;;  %v2474_v13 = vld [vmem:[#allocation2 + $0xe0] sm:$0xff]   ;;  %v2478_v17 = vld [vmem:[#allocation2 + $0xd8] sm:$0xff]   ;;  %v2481_v20 = vld [vmem:[#allocation2 + $0x50] sm:$0xff]   ;;  %v2733_v37 = vsub.s32 %v117_v32, %v2730_v33 }
  0x2b   :  { %v2475_v14 = vld [vmem:[#allocation2 + $0x20] sm:$0xff]   ;;  %v2479_v18 = vld [vmem:[#allocation2 + $0x18] sm:$0xff]   ;;  %v2482_v21 = vld [vmem:[#allocation2 + $0xd0] sm:$0xff]  }
  0x2c   :  { %2335 = vmatpush3.bf16.msra.mxu0 %v2467_v6  ;;  %v2476_v15 = vld [vmem:[#allocation2 + $0xa0] sm:$0xff]   ;;  %v2480_v19 = vld [vmem:[#allocation2 + $0x98] sm:$0xff]   ;;  %v2483_v22 = vld [vmem:[#allocation2 + $0x10] sm:$0xff]  }
  0x2d   :  { %2357 = vmatpush3.bf16.msra.mxu1 %v2468_v7  ;;  %2336 = vmatprep.subr.bf16.mxu0 %v2469_v8  ;;  %v2484_v23 = vld [vmem:[#allocation2 + $0x90] sm:$0xff]   ;;  %v2485_v24 = vld [vmem:[#allocation2 + $0x48] sm:$0xff]   ;;  %v2489_v31 = vld [vmem:[#allocation2 + $0x40] sm:$0xff]  }
  0x2e   :  { %2358 = vmatprep.subr.bf16.mxu1 %v2470_v9  ;;  %v2486_v28 = vld [vmem:[#allocation2 + $0xc8] sm:$0xff]   ;;  %v2490_v34 = vld [vmem:[#allocation2 + $0xc0] sm:$0xff]   ;;  %v2505_v53 = vld [vmem:[#allocation2 + $0x178] sm:$0xff]  }
  0x2f   :  { %v2487_v29 = vld [vmem:[#allocation2 + $0x8] sm:$0xff]   ;;  %v2491_v35 = vld [vmem:[#allocation2] sm:$0xff]   ;;  %v2506_v58 = vld [vmem:[#allocation2 + $0x1f8] sm:$0xff]  }
  0x30   :  { %2337 = vmatpush3.bf16.msra.mxu0 %v2471_v10  ;;  %v2488_v30 = vld [vmem:[#allocation2 + $0x88] sm:$0xff]   ;;  %v2492_v36 = vld [vmem:[#allocation2 + $0x80] sm:$0xff]   ;;  %v2507_v62 = vld [vmem:[#allocation2 + $0x138] sm:$0xff]  }
  0x31   :  { %2359 = vmatpush3.bf16.msra.mxu1 %v2472_v11  ;;  %2338 = vmatprep.subr.bf16.mxu0 %v2473_v12  ;;  %v2493_v38 = vld [vmem:[%s2919_s0] ss:$16 sps:$4 sm:$0xff]   ;;  %v2501_v43 = vld [vmem:[%s2919_s0 + $0x4] ss:$16 sps:$4 sm:$0xff]   ;;  %v2508_v2 = vld [vmem:[#allocation2 + $0x1b8] sm:$0xff]  }
  0x32   :  { %2360 = vmatprep.subr.bf16.mxu1 %v2474_v13  ;;  %v2495_v39 = vld [vmem:[%s2919_s0 + $0x20] ss:$16 sps:$4 sm:$0xff]   ;;  %v121_v42 = vrot.slane %v2493_v38, %v2733_v37  ;;  %v2502_v44 = vld [vmem:[%s2919_s0 + $0x24] ss:$16 sps:$4 sm:$0xff]   ;;  %v128_v50 = vrot.slane %v2501_v43, %v2733_v37  ;;  %v2513_v10 = vld [vmem:[#allocation2 + $0x168] sm:$0xff]  }
  0x33   :  { %v2497_v40 = vld [vmem:[%s2919_s0 + $0x40] ss:$16 sps:$4 sm:$0xff]   ;;  %v2503_v45 = vld [vmem:[%s2919_s0 + $0x44] ss:$16 sps:$4 sm:$0xff]   ;;  %v135_v46 = vrot.slane %v2495_v39, %v2733_v37  ;;  %v142_v51 = vrot.slane %v2502_v44, %v2733_v37  ;;  %v2514_v11 = vld [vmem:[#allocation2 + $0x1e8] sm:$0xff]  }
  0x34   :  { %2339 = vmatpush3.bf16.msra.mxu0 %v2475_v14  ;;  %v2499_v41 = vld [vmem:[%s2919_s0 + $0x60] ss:$16 sps:$4 sm:$0xff]   ;;  %v193_v47 = vrot.slane %v2497_v40, %v2733_v37  ;;  %v2504_v49 = vld [vmem:[%s2919_s0 + $0x64] ss:$16 sps:$4 sm:$0xff]   ;;  %v200_v52 = vrot.slane %v2503_v45, %v2733_v37  ;;  %v2515_v12 = vld [vmem:[#allocation2 + $0x128] sm:$0xff]  }
  0x35   :  { %2361 = vmatpush3.bf16.msra.mxu1 %v2476_v15  ;;  %2340 = vmatprep.subr.bf16.mxu0 %v2477_v16  ;;  %v207_v48 = vrot.slane %v2499_v41, %v2733_v37  ;;  %v144_v54 = vcombine.high %v121_v42, %v135_v46  ;;  %v214_v56 = vrot.slane %v2504_v49, %v2733_v37  ;;  %v2509_v4 = vld [vmem:[#allocation2 + $0x170] sm:$0xff]   ;;  %v2516_v13 = vld [vmem:[#allocation2 + $0x1a8] sm:$0xff]   ;;  %v2517_v14 = vld [vmem:[#allocation2 + $0x160] sm:$0xff]  }
  0x36   :  { %2362 = vmatprep.subr.bf16.mxu1 %v2478_v17  ;;  %v143_v57 = vcombine.low %v121_v42, %v135_v46  ;;  %v146_v59 = vcombine.high %v128_v50, %v142_v51  ;;  %v145_v61 = vcombine.low %v128_v50, %v142_v51  ;;  %v2510_v7 = vld [vmem:[#allocation2 + $0x1f0] sm:$0xff]   ;;  %v2518_v15 = vld [vmem:[#allocation2 + $0x1e0] sm:$0xff]   ;;  %v2529_v26 = vld [vmem:[#allocation2 + $0x148] sm:$0xff]  }
  0x37   :  { %v216_v55 = vcombine.high %v193_v47, %v207_v48  ;;  %v215_v60 = vcombine.low %v193_v47, %v207_v48  ;;  %v218_v0 = vcombine.high %v200_v52, %v214_v56  ;;  %v217_v1 = vcombine.low %v200_v52, %v214_v56  ;;  %v2511_v8 = vld [vmem:[#allocation2 + $0x130] sm:$0xff]   ;;  %v2519_v16 = vld [vmem:[#allocation2 + $0x120] sm:$0xff]   ;;  %v2530_v27 = vld [vmem:[#allocation2 + $0x1c8] sm:$0xff]  }
  0x38   :  { %2341 = vmatpush3.bf16.msra.mxu0 %v2479_v18  ;;  %v2512_v9 = vld [vmem:[#allocation2 + $0x1b0] sm:$0xff]   ;;  %v2520_v17 = vld [vmem:[#allocation2 + $0x1a0] sm:$0xff]   ;;  %v2521_v18 = vld [vmem:[#allocation2 + $0x158] sm:$0xff]  }
  0x39   :  { %2363 = vmatpush3.bf16.msra.mxu1 %v2480_v19  ;;  %2342 = vmatprep.subr.bf16.mxu0 %v2481_v20  ;;  %v272_v63 = vpack.c.bf16 %v216_v55, %v144_v54  ;;  %v271_v3 = vpack.c.bf16 %v215_v60, %v143_v57  ;;  %v274_v5 = vpack.c.bf16 %v218_v0, %v146_v59  ;;  %v2522_v19 = vld [vmem:[#allocation2 + $0x1d8] sm:$0xff]   ;;  %v2528_v25 = vld [vmem:[#allocation2 + $0x190] sm:$0xff]   ;;  %v2535_v32 = vld [vmem:[#allocation2 + $0x100] sm:$0xff]  }
  0x3a   :  { %2364 = vmatprep.subr.bf16.mxu1 %v2482_v21  ;;  %v273_v6 = vpack.c.bf16 %v217_v1, %v145_v61  ;;  %v2523_v20 = vld [vmem:[#allocation2 + $0x118] sm:$0xff]   ;;  %v2554_v1 = vld [vmem:[%s2923_s4 + $0x64] ss:$8 sps:$4 sm:$0xff]  }
  0x3b   :  { %830 = vmatprep.mubr.bf16.mxu0 %v272_v63  ;;  %871 = vmatprep.mubr.bf16.mxu1 %v274_v5  ;;  %v2524_v21 = vld [vmem:[#allocation2 + $0x198] sm:$0xff]   ;;  %v2560_v5 = vld [vmem:[%s2923_s4 + $0x44] ss:$8 sps:$4 sm:$0xff]  }
  0x3c   :  { %2343 = vmatpush3.bf16.msra.mxu0 %v2483_v22  ;;  %v2525_v22 = vld [vmem:[#allocation2 + $0x150] sm:$0xff]   ;;  %v2541_v38 = vld [vmem:[%s2919_s0 + $0x48] ss:$16 sps:$4 sm:$0xff]   ;;  %v2545_v40 = vld [vmem:[%s2919_s0 + $0xc] ss:$16 sps:$4 sm:$0xff]  }
  0x3d   :  { %2365 = vmatpush3.bf16.msra.mxu1 %v2484_v23  ;;  %2344 = vmatprep.subr.bf16.mxu0 %v2485_v24  ;;  %v2526_v23 = vld [vmem:[#allocation2 + $0x1d0] sm:$0xff]   ;;  %v2543_v39 = vld [vmem:[%s2919_s0 + $0x68] ss:$16 sps:$4 sm:$0xff]   ;;  %v2546_v41 = vld [vmem:[%s2919_s0 + $0x2c] ss:$16 sps:$4 sm:$0xff]   ;;  %v229_v44 = vrot.slane %v2541_v38, %v2733_v37  ;;  %v164_v48 = vrot.slane %v2545_v40, %v2733_v37 }
  0x3e   :  { %2366 = vmatprep.subr.bf16.mxu1 %v2486_v28  ;;  %v2527_v24 = vld [vmem:[#allocation2 + $0x110] sm:$0xff]   ;;  %v2531_v28 = vld [vmem:[#allocation2 + $0x108] sm:$0xff]   ;;  %v243_v47 = vrot.slane %v2543_v39, %v2733_v37  ;;  %v178_v49 = vrot.slane %v2546_v41, %v2733_v37 }
  0x3f   :  { %v2547_v45 = vld [vmem:[%s2919_s0 + $0x4c] ss:$16 sps:$4 sm:$0xff]   ;;  %v2549_v0 = vld [vmem:[%s2923_s4 + $0x70] ss:$8 sps:$4 sm:$0xff]  }
  0x40   :  { %2345 = vmatpush3.bf16.msra.mxu0 %v2487_v29  ;;  %v2532_v29 = vld [vmem:[#allocation2 + $0x188] sm:$0xff]   ;;  %v236_v51 = vrot.slane %v2547_v45, %v2733_v37  ;;  %v252_v54 = vcombine.high %v229_v44, %v243_v47  ;;  %v182_v55 = vcombine.high %v164_v48, %v178_v49  ;;  %v251_v56 = vcombine.low %v229_v44, %v243_v47 }
  0x41   :  { %2367 = vmatpush3.bf16.msra.mxu1 %v2488_v30  ;;  %2346 = vmatprep.subr.bf16.mxu0 %v2489_v31  ;;  %v2533_v30 = vld [vmem:[#allocation2 + $0x140] sm:$0xff]   ;;  %v2548_v46 = vld [vmem:[%s2919_s0 + $0x6c] ss:$16 sps:$4 sm:$0xff]   ;;  %v181_v57 = vcombine.low %v164_v48, %v178_v49 }
  0x42   :  { %2368 = vmatprep.subr.bf16.mxu1 %v2490_v34  ;;  %v2534_v31 = vld [vmem:[#allocation2 + $0x1c0] sm:$0xff]   ;;  %v250_v52 = vrot.slane %v2548_v46, %v2733_v37 }
  0x43   :  { %v2536_v34 = vld [vmem:[#allocation2 + $0x180] sm:$0xff]  }
  0x44   :  { %2347 = vmatpush3.bf16.msra.mxu0 %v2491_v35  ;;  %v2537_v35 = vld [vmem:[%s2919_s0 + $0x8] ss:$16 sps:$4 sm:$0xff]   ;;  %v253_v59 = vcombine.low %v236_v51, %v250_v52 }
  0x45   :  { %2369 = vmatpush3.bf16.msra.mxu1 %v2492_v36  ;;  %2376 = vmatprep.subr.bf16.mxu0 %v2505_v53  ;;  %v2539_v36 = vld [vmem:[%s2919_s0 + $0x28] ss:$16 sps:$4 sm:$0xff]   ;;  %v157_v42 = vrot.slane %v2537_v35, %v2733_v37 }
  0x46   :  { %2398 = vmatprep.subr.bf16.mxu1 %v2506_v58  ;;  %v171_v43 = vrot.slane %v2539_v36, %v2733_v37  ;;  %v254_v58 = vcombine.high %v236_v51, %v250_v52  ;;  %v277_v63 = vpack.c.bf16 %v253_v59, %v181_v57  ;;  %v2551_v37 = vld [vmem:[%s2923_s4 + $0x74] ss:$8 sps:$4 sm:$0xff]   ;;  %v2575_v57 = vld [vmem:[#allocation4 + $0x28] sm:$0xff]  }
  0x47   :  { %831 = vmatmul.mubr.bf16.vlgmr.msra.gmra.mxu0 %v271_v3  ;;  %v2557_v3 = vld [vmem:[%s2923_s4 + $0x54] ss:$8 sps:$4 sm:$0xff]  }
  0x48   :  { %2377 = vmatpush3.bf16.msra.mxu0 %v2507_v62  ;;  %872 = vmatmul.mubr.bf16.vlgmr.msra.gmra.mxu1 %v273_v6  ;;  %v180_v50 = vcombine.high %v157_v42, %v171_v43  ;;  %v179_v53 = vcombine.low %v157_v42, %v171_v43  ;;  %v278_v62 = vpack.c.bf16 %v254_v58, %v182_v55  ;;  %v2558_v6 = vld [vmem:[%s2923_s4 + $0x40] ss:$8 sps:$4 sm:$0xff]   ;;  %v2658_v55 = vmov 0.0   ;;  %v2577_v59 = vld [vmem:[#allocation4 + $0x18] sm:$0xff]  }
  0x49   :  { %2378 = vmatprep.subr.bf16.mxu0 %v2509_v4  ;;  %2399 = vmatpush3.bf16.msra.mxu1 %v2508_v2  ;;  %v2552_v2 = vld [vmem:[%s2923_s4 + $0x60] ss:$8 sps:$4 sm:$0xff]   ;;  %v2555_v4 = vld [vmem:[%s2923_s4 + $0x50] ss:$8 sps:$4 sm:$0xff]  }
  0x4a   :  { %2400 = vmatprep.subr.bf16.mxu1 %v2510_v7  ;;  %v276_v60 = vpack.c.bf16 %v252_v54, %v180_v50  ;;  %v275_v61 = vpack.c.bf16 %v251_v56, %v179_v53  ;;  %953 = vmatprep.mubr.bf16.mxu1 %v278_v62  ;;  %v2563_v7 = vld [vmem:[%s2923_s4 + $0x34] ss:$8 sps:$4 sm:$0xff]   ;;  %v2576_v58 = vld [vmem:[#allocation4 + $0x20] sm:$0xff]  }
  0x4b   :  { %v2573_v54 = vld [vmem:[#allocation4 + $0x38] sm:$0xff]   ;;  %v2574_v56 = vld [vmem:[#allocation4 + $0x30] sm:$0xff]   ;;  %v2580_v62 = vld [vmem:[#allocation4] sm:$0xff]  }
  0x4c   :  { %2379 = vmatpush3.bf16.msra.mxu0 %v2511_v8  ;;  %912 = vmatprep.mubr.bf16.mxu0 %v276_v60  ;;  %v2561_v8 = vld [vmem:[%s2923_s4 + $0x30] ss:$8 sps:$4 sm:$0xff]  }
  0x4d   :  { %2380 = vmatprep.subr.bf16.mxu0 %v2513_v10  ;;  %2401 = vmatpush3.bf16.msra.mxu1 %v2512_v9  ;;  %v2566_v9 = vld [vmem:[%s2923_s4 + $0x24] ss:$8 sps:$4 sm:$0xff]   ;;  %v2564_v10 = vld [vmem:[%s2923_s4 + $0x20] ss:$8 sps:$4 sm:$0xff]   ;;  %v2578_v60 = vld [vmem:[#allocation4 + $0x10] sm:$0xff]  }
  0x4e   :  { %2402 = vmatprep.subr.bf16.mxu1 %v2514_v11  ;;  %v2569_v11 = vld [vmem:[%s2923_s4 + $0x14] ss:$8 sps:$4 sm:$0xff]  }
  0x50   :  { %2381 = vmatpush3.bf16.msra.mxu0 %v2515_v12  ;;  %v2567_v12 = vld [vmem:[%s2923_s4 + $0x10] ss:$8 sps:$4 sm:$0xff]  }
  0x51   :  { %2382 = vmatprep.subr.bf16.mxu0 %v2517_v14  ;;  %2403 = vmatpush3.bf16.msra.mxu1 %v2516_v13  ;;  %v2572_v13 = vld [vmem:[%s2923_s4 + $0x4] ss:$8 sps:$4 sm:$0xff]   ;;  %v2570_v14 = vld [vmem:[%s2923_s4] ss:$8 sps:$4 sm:$0xff]  }
  0x52   :  { %2404 = vmatprep.subr.bf16.mxu1 %v2518_v15  ;;  %v2657_v15 = vmov 0  }
  0x54   :  { %2383 = vmatpush3.bf16.msra.mxu0 %v2519_v16 }
  0x55   :  { %2384 = vmatprep.subr.bf16.mxu0 %v2521_v18  ;;  %2405 = vmatpush3.bf16.msra.mxu1 %v2520_v17 }
  0x56   :  { %2406 = vmatprep.subr.bf16.mxu1 %v2522_v19 }
  0x58   :  { %2385 = vmatpush3.bf16.msra.mxu0 %v2523_v20 }
  0x59   :  { %2386 = vmatprep.subr.bf16.mxu0 %v2525_v22  ;;  %2407 = vmatpush3.bf16.msra.mxu1 %v2524_v21 }
  0x5a   :  { %2408 = vmatprep.subr.bf16.mxu1 %v2526_v23  ;;  %v2164_v23 = vld [vmem:[%s2922_s3] ss:$0 sm:$0xff] }
  0x5c   :  { %2387 = vmatpush3.bf16.msra.mxu0 %v2527_v24 }
  0x5d   :  { %2388 = vmatprep.subr.bf16.mxu0 %v2529_v26  ;;  %2409 = vmatpush3.bf16.msra.mxu1 %v2528_v25 }
  0x5e   :  { %2410 = vmatprep.subr.bf16.mxu1 %v2530_v27 }
  0x60   :  { %2389 = vmatpush3.bf16.msra.mxu0 %v2531_v28 }
  0x61   :  { %2390 = vmatprep.subr.bf16.mxu0 %v2533_v30  ;;  %2411 = vmatpush3.bf16.msra.mxu1 %v2532_v29 }
  0x62   :  { %2412 = vmatprep.subr.bf16.mxu1 %v2534_v31 }
  0x64   :  { %2391 = vmatpush3.bf16.msra.mxu0 %v2535_v32 }
  0x65   :  { %2413 = vmatpush3.bf16.msra.mxu1 %v2536_v34  ;;  %1073 = vmatprep.subr.bf16.mxu0 %v2551_v37  ;;  %v2852_v37 = vld [vmem:[#allocation6 + $0x1c8] sm:$0xff] }
  0x66   :  { %2429 = vmatprep.subr.bf16.mxu1 %v2658_v55 }
  0x67   :  { %913 = vmatmul.mubr.bf16.vlgmr.msra.gmra.mxu0 %v275_v61  ;;  %v2579_v61 = vld [vmem:[#allocation4 + $0x8] sm:$0xff]  }
  0x68   :  { %954 = vmatmul.mubr.bf16.vlgmr.msra.gmra.mxu1 %v277_v63  ;;  %1074 = vmatpush1.bf16.msra.mxu0 %v2549_v0  ;;  %v1300_v63 = vld [vmem:[#allocation6 + $0x1c0] sm:$0xff] }
  0x69   :  { %1075 = vmatprep.subr.bf16.mxu0 %v2554_v1  ;;  %1105 = vmatprep.mubr.bf16.mxu0 %v2657_v15  ;;  %v1304_v0 = vld [vmem:[#allocation6 + $0x1e0] sm:$0xff] }
  0x6a   :  { %2430 = vmatpush3.bf16.msra.mxu1 %v2573_v54  ;;  %2445 = vmatprep.mubr.msk.bf16.mxu1 %vm2659_vm0, %v2658_v55  ;;  %v2310_v1 = vcombine.low %v1300_v63, %v1304_v0  ;;  %v1122_v54 = vld [vmem:[%s2920_s1] sm:$0xff] }
  0x6b   :  { %2431 = vmatprep.subr.bf16.mxu1 %v2658_v55 }
  0x6c   :  { %1076 = vmatpush1.bf16.msra.mxu0 %v2552_v2  ;;  %v2311_v2 = vcombine.high %v1300_v63, %v1304_v0 }
  0x6d   :  { %1077 = vmatprep.subr.bf16.mxu0 %v2557_v3  ;;  %v2854_v3 = vld [vmem:[#allocation6 + $0x1e8] sm:$0xff] }
  0x6e   :  { %2432 = vmatpush3.bf16.msra.mxu1 %v2574_v56 }
  0x6f   :  { %2433 = vmatprep.subr.bf16.mxu1 %v2658_v55 }
  0x70   :  { %1078 = vmatpush1.bf16.msra.mxu0 %v2555_v4  ;;  %v1292_v4 = vld [vmem:[#allocation6 + $0x180] sm:$0xff] }
  0x71   :  { %1079 = vmatprep.subr.bf16.mxu0 %v2560_v5  ;;  %v1296_v5 = vld [vmem:[#allocation6 + $0x1a0] sm:$0xff] }
  0x72   :  { %2434 = vmatpush3.bf16.msra.mxu1 %v2575_v57 }
  0x73   :  { %2435 = vmatprep.subr.bf16.mxu1 %v2658_v55 }
  0x74   :  { %1080 = vmatpush1.bf16.msra.mxu0 %v2558_v6  ;;  %v2312_v6 = vcombine.low %v2852_v37, %v2854_v3 }
  0x75   :  { %1081 = vmatprep.subr.bf16.mxu0 %v2563_v7  ;;  %v2313_v7 = vcombine.high %v2852_v37, %v2854_v3  ;;  %v1265_v37 = vld [vmem:[#allocation6 + $0xa8] sm:$0xff] }
  0x76   :  { %2436 = vmatpush3.bf16.msra.mxu1 %v2576_v58 }
  0x77   :  { %2437 = vmatprep.subr.bf16.mxu1 %v2658_v55 }
  0x78   :  { %1082 = vmatpush1.bf16.msra.mxu0 %v2561_v8  ;;  %v2303_v8 = vcombine.high %v1292_v4, %v1296_v5 }
  0x79   :  { %1083 = vmatprep.subr.bf16.mxu0 %v2566_v9  ;;  %v2302_v9 = vcombine.low %v1292_v4, %v1296_v5 }
  0x7a   :  { %2438 = vmatpush3.bf16.msra.mxu1 %v2577_v59  ;;  %v1293_v59 = vld [vmem:[#allocation6 + $0x188] sm:$0xff] }
  0x7b   :  { %2439 = vmatprep.subr.bf16.mxu1 %v2658_v55 }
  0x7c   :  { %1084 = vmatpush1.bf16.msra.mxu0 %v2564_v10  ;;  %v1284_v10 = vld [vmem:[#allocation6 + $0x140] sm:$0xff] }
  0x7d   :  { %1085 = vmatprep.subr.bf16.mxu0 %v2569_v11  ;;  %v1288_v11 = vld [vmem:[#allocation6 + $0x160] sm:$0xff] }
  0x7e   :  { %2440 = vmatpush3.bf16.msra.mxu1 %v2578_v60  ;;  %v1297_v60 = vld [vmem:[#allocation6 + $0x1a8] sm:$0xff] }
  0x7f   :  { %2441 = vmatprep.subr.bf16.mxu1 %v2658_v55  ;;  %v2305_v0 = vcombine.high %v1293_v59, %v1297_v60  ;;  %v2304_v4 = vcombine.low %v1293_v59, %v1297_v60 }
  0x80   :  { %1086 = vmatpush1.bf16.msra.mxu0 %v2567_v12  ;;  %v2295_v12 = vcombine.high %v1284_v10, %v1288_v11 }
  0x81   :  { %1087 = vmatprep.subr.bf16.mxu0 %v2572_v13  ;;  %v2294_v13 = vcombine.low %v1284_v10, %v1288_v11  ;;  %v1269_v11 = vld [vmem:[#allocation6 + $0xc8] sm:$0xff] }
  0x82   :  { %2442 = vmatpush3.bf16.msra.mxu1 %v2579_v61 }
  0x83   :  { %2443 = vmatprep.subr.bf16.mxu1 %v2658_v55  ;;  %v1123_v55 = vld [vmem:[%s2920_s1 + $0x8] sm:$0xff] }
  0x84   :  { %1088 = vmatpush1.bf16.msra.mxu0 %v2570_v14  ;;  %v1276_v14 = vld [vmem:[#allocation6 + $0x100] sm:$0xff] }
  0x85   :  { %1670 = vmatprep.subr.bf16.mxu0 %v2311_v2  ;;  %v1289_v2 = vld [vmem:[#allocation6 + $0x168] sm:$0xff] }
  0x86   :  { %2444 = vmatpush3.bf16.msra.mxu1 %v2580_v62 }
  0x87   :  { %1713 = vmatprep.subr.bf16.mxu1 %v2313_v7  ;;  %v1277_v7 = vld [vmem:[#allocation6 + $0x108] sm:$0xff] }
 0x107   :  { %v2348_v16 = vpop.f32.mrf.mxu0 }
 0x108   :  { %v2370_v17 = vpop.f32.mrf.mxu1 }
 0x109   :  { %v2349_v18 = vpop.f32.mrf.mxu0 }
 0x10a   :  { %v2371_v19 = vpop.f32.mrf.mxu1  ;;  %v2350_v21 = vadd.f32 %v2349_v18, %v2348_v16  ;;  %v1280_v16 = vld [vmem:[#allocation6 + $0x120] sm:$0xff] }
 0x10b   :  { %v2351_v20 = vpop.f32.mrf.mxu0  ;;  %v2372_v26 = vadd.f32 %v2371_v19, %v2370_v17  ;;  %v2287_v17 = vcombine.high %v1276_v14, %v1280_v16  ;;  %v2286_v18 = vcombine.low %v1276_v14, %v1280_v16  ;;  %v1268_v19 = vld [vmem:[#allocation6 + $0xc0] sm:$0xff]  ;;  %v1261_v16 = vld [vmem:[#allocation6 + $0x88] sm:$0xff] }
 0x10c   :  { %v2373_v22 = vpop.f32.mrf.mxu1  ;;  %v833_v25 = vadd.f32 %v2350_v21, %v2164_v23 }
 0x10d   :  { %v2352_v24 = vpop.f32.mrf.mxu0 }
 0x10e   :  { %v2353_v27 = vadd.f32 %v2352_v24, %v2351_v20  ;;  %v2374_v28 = vpop.f32.mrf.mxu1  ;;  %v874_v32 = vadd.f32 %v2372_v26, %v833_v25  ;;  %v1272_v20 = vld [vmem:[#allocation6 + $0xe0] sm:$0xff] }
 0x10f   :  { %v2375_v39 = vadd.f32 %v2374_v28, %v2373_v22  ;;  %v2279_v21 = vcombine.high %v1268_v19, %v1272_v20  ;;  %v2278_v22 = vcombine.low %v1268_v19, %v1272_v20  ;;  %v1264_v24 = vld [vmem:[#allocation6 + $0xa0] sm:$0xff]  ;;  %v989_v28 = vsub.s32 1, %v2730_v33  ;;  %v1253_v20 = vld [vmem:[#allocation6 + $0x48] sm:$0xff] }
 0x110   :  { %v836_v34 = vadd.f32 %v2353_v27, %v2164_v23  ;;  %v1260_v23 = vld [vmem:[#allocation6 + $0x80] sm:$0xff]  ;;  %v985_v27 = vsub.s32 0, %v2730_v33 }
 0x111   :  { %v2271_v25 = vcombine.high %v1260_v23, %v1264_v24  ;;  %v2270_v26 = vcombine.low %v1260_v23, %v1264_v24  ;;  %v1256_v19 = vld [vmem:[#allocation6 + $0x60] sm:$0xff] }
 0x112   :  { %v877_v43 = vadd.f32 %v2375_v39, %v836_v34 }
 0x127   :  { %v2392_v29 = vpop.f32.mrf.mxu0 }
 0x128   :  { %v2414_v30 = vpop.f32.mrf.mxu1 }
 0x129   :  { %v2393_v31 = vpop.f32.mrf.mxu0 }
 0x12a   :  { %v2394_v35 = vadd.f32 %v2393_v31, %v2392_v29  ;;  %v2415_v36 = vpop.f32.mrf.mxu1  ;;  %v2660_v29 = vmov 1966171168   ;;  %v981_v31 = vld [vmem:[%s2924_s5] sm:$0x3] }
 0x12b   :  { %v2395_v38 = vpop.f32.mrf.mxu0  ;;  %v2416_v44 = vadd.f32 %v2415_v36, %v2414_v30  ;;  %v1867_v30 = vunpack.c.l.s4 %v2660_v29  ;;  %v990_v34 = vrot.slane %v981_v31, %v989_v28  ;;  %v1248_v29 = vld [vmem:[#allocation6 + $0x20] sm:$0xff] }
 0x12c   :  { %v915_v40 = vadd.f32 %v2394_v35, %v874_v32  ;;  %v2417_v41 = vpop.f32.mrf.mxu1  ;;  %v986_v32 = vrot.slane %v981_v31, %v985_v27 }
 0x12d   :  { %v2396_v42 = vpop.f32.mrf.mxu0  ;;  %v1868_v35 = vunpack.c.0.s8 %v1867_v30  ;;  %v1245_v30 = vld [vmem:[#allocation6 + $0x8] sm:$0xff] }
 0x12e   :  { %v2397_v45 = vadd.f32 %v2396_v42, %v2395_v38  ;;  %v2418_v46 = vpop.f32.mrf.mxu1  ;;  %v956_v47 = vadd.f32 %v2416_v44, %v915_v40 }
 0x12f   :  { %v2419_v49 = vadd.f32 %v2418_v46, %v2417_v41  ;;  %v2870_v41 = vsub.s32 %v1868_v35, %v2730_v33 }
 0x130   :  { %v918_v48 = vadd.f32 %v2397_v45, %v877_v43  ;;  %v962_v51 = vmax.f32 %v956_v47, 0.0 }
 0x132   :  { %v959_v50 = vadd.f32 %v2419_v49, %v918_v48 }
 0x134   :  { %v963_v52 = vmax.f32 %v959_v50, 0.0 }
 0x136   :  { %v964_v53 = vpack.c.bf16 %v963_v52, %v962_v51 }
 0x138   :  { %1106 = vmatmul.mubr.bf16.vlgmr.msra.gmra.mxu0 %v964_v53 }
 0x139   :  { %1702 = vmatprep.mubr.bf16.mxu0 %v2657_v15  ;;  %1671 = vmatpush1.bf16.msra.mxu0 %v2310_v1  ;;  %v1285_v1 = vld [vmem:[#allocation6 + $0x148] sm:$0xff] }
 0x13a   :  { %1672 = vmatprep.subr.bf16.mxu0 %v2303_v8  ;;  %v2297_v5 = vcombine.high %v1285_v1, %v1289_v2  ;;  %v1281_v8 = vld [vmem:[#allocation6 + $0x128] sm:$0xff] }
 0x13b   :  { %v2289_v10 = vcombine.high %v1277_v7, %v1281_v8 }
 0x13d   :  { %1673 = vmatpush1.bf16.msra.mxu0 %v2302_v9  ;;  %v2296_v9 = vcombine.low %v1285_v1, %v1289_v2  ;;  %v1287_v1 = vld [vmem:[#allocation6 + $0x158] sm:$0xff] }
 0x13e   :  { %1674 = vmatprep.subr.bf16.mxu0 %v2295_v12  ;;  %v1273_v12 = vld [vmem:[#allocation6 + $0xe8] sm:$0xff]  ;;  %v1291_v2 = vld [vmem:[#allocation6 + $0x178] sm:$0xff] }
 0x13f   :  { %v2281_v14 = vcombine.high %v1269_v11, %v1273_v12  ;;  %v2280_v3 = vcombine.low %v1269_v11, %v1273_v12  ;;  %v1279_v11 = vld [vmem:[#allocation6 + $0x118] sm:$0xff] }
 0x140   :  { %v1283_v12 = vld [vmem:[#allocation6 + $0x138] sm:$0xff] }
 0x141   :  { %1675 = vmatpush1.bf16.msra.mxu0 %v2294_v13  ;;  %v2288_v13 = vcombine.low %v1277_v7, %v1281_v8  ;;  %v2301_v8 = vcombine.high %v1287_v1, %v1291_v2 }
 0x142   :  { %1676 = vmatprep.subr.bf16.mxu0 %v2287_v17  ;;  %v2272_v17 = vcombine.low %v1261_v16, %v1265_v37 }
 0x145   :  { %1677 = vmatpush1.bf16.msra.mxu0 %v2286_v18  ;;  %v1252_v18 = vld [vmem:[#allocation6 + $0x40] sm:$0xff] }
 0x146   :  { %1678 = vmatprep.subr.bf16.mxu0 %v2279_v21  ;;  %v2263_v21 = vcombine.high %v1252_v18, %v1256_v19  ;;  %v2262_v23 = vcombine.low %v1252_v18, %v1256_v19  ;;  %v1275_v18 = vld [vmem:[#allocation6 + $0xf8] sm:$0xff] }
 0x149   :  { %1679 = vmatpush1.bf16.msra.mxu0 %v2278_v22  ;;  %v1257_v22 = vld [vmem:[#allocation6 + $0x68] sm:$0xff] }
 0x14a   :  { %1680 = vmatprep.subr.bf16.mxu0 %v2271_v25  ;;  %v2264_v24 = vcombine.low %v1253_v20, %v1257_v22  ;;  %v2265_v25 = vcombine.high %v1253_v20, %v1257_v22  ;;  %v2292_v20 = vcombine.low %v1279_v11, %v1283_v12  ;;  %v1262_v22 = vld [vmem:[#allocation6 + $0x90] sm:$0xff] }
 0x14d   :  { %1681 = vmatpush1.bf16.msra.mxu0 %v2270_v26  ;;  %v1244_v26 = vld [vmem:[#allocation6] sm:$0xff] }
 0x14e   :  { %1682 = vmatprep.subr.bf16.mxu0 %v2263_v21  ;;  %v2255_v31 = vcombine.high %v1244_v26, %v1248_v29 }
 0x151   :  { %1683 = vmatpush1.bf16.msra.mxu0 %v2262_v23  ;;  %v1266_v23 = vld [vmem:[#allocation6 + $0xb0] sm:$0xff] }
 0x152   :  { %1684 = vmatprep.subr.bf16.mxu0 %v2255_v31 }
 0x1f8   :  { %v1107_v36 = vpop.f32.mrf.mxu0 }
 0x1f9   :  { %v1108_v39 = vadd.f32 %v1107_v36, %v986_v32 }
 0x1fa   :  { %v1109_v38 = vpop.f32.mrf.mxu0 }
 0x1fb   :  { %v1110_v40 = vadd.f32 %v1109_v38, %v990_v34  ;;  %v1302_v38 = vld [vmem:[#allocation6 + $0x1d0] sm:$0xff] }
 0x1fc   :  { %v1111_v42 = vpop.f32.mrf.mxu0 }
 0x1fd   :  { %v1116_v43 = vmul.f32 0.5, %v1110_v40  ;;  %v2326_v44 = vpack.c.bf16 %v1110_v40, %v1108_v39  ;;  %v1112_v49 = vadd.f32 %v1111_v42, %v986_v32  ;;  %v1249_v32 = vld [vmem:[#allocation6 + $0x28] sm:$0xff]  ;;  %v1303_v40 = vld [vmem:[#allocation6 + $0x1d8] sm:$0xff] }
 0x1fe   :  { %v1113_v45 = vpop.f32.mrf.mxu0  ;;  %v2256_v35 = vcombine.low %v1245_v30, %v1249_v32  ;;  %v2257_v36 = vcombine.high %v1245_v30, %v1249_v32  ;;  %v2275_v30 = vcombine.high %v1262_v22, %v1266_v23  ;;  %v1254_v32 = vld [vmem:[#allocation6 + $0x50] sm:$0xff] }
 0x1ff   :  { %v1118_v46 = vmul.f32 1.442695, %v1116_v43  ;;  %v2022_v47 = vrot.slane %v2326_v44, %v2870_v41  ;;  %v1114_v48 = vadd.f32 %v1113_v45, %v990_v34  ;;  %v2254_v34 = vcombine.low %v1244_v26, %v1248_v29  ;;  %v1307_v44 = vld [vmem:[#allocation6 + $0x1f8] sm:$0xff] }
 0x200   :  { %v2316_v45 = vcombine.low %v1303_v40, %v1307_v44 }
 0x201   :  { %2581 = vpow2.f32 %v1118_v46  ;;  %2328 = vst.sshfl [vmem:[#allocation8] sm:$0x5 pattern:$0x73625140] %v2022_v47  ;;  %v1117_v50 = vmul.f32 0.5, %v1114_v48  ;;  %1685 = vmatpush1.bf16.msra.mxu0 %v2254_v34  ;;  %v2317_v46 = vcombine.high %v1303_v40, %v1307_v44  ;;  %v1258_v34 = vld [vmem:[#allocation6 + $0x70] sm:$0xff] }
 0x202   :  { %v2245_v47 = vld [vmem:[%s2926_s7] ss:$0 sm:$0xff]  ;;  %v2267_v40 = vcombine.high %v1254_v32, %v1258_v34  ;;  %v1250_v44 = vld [vmem:[#allocation6 + $0x30] sm:$0xff] }
 0x203   :  { %v1120_v51 = vmul.f32 1.442695, %v1117_v50 }
 0x205   :  { %2583 = vpow2.f32 %v1120_v51 }
 0x208   :  { %v2133_v52 = vld [vmem:[#allocation8] sm:$0x3] }
 0x209   :  { %2134 = vst [vmem:[%s2930_s11] sm:$0x3] %v2133_v52 }
 0x20e   :  { %v2582_v53 = vpop.eup %2581 }
 0x20f   :  { %v1124_v56 = vmul.f32 %v2582_v53, %v1122_v54  ;;  %v1294_v53 = vld [vmem:[#allocation6 + $0x190] sm:$0xff] }
 0x211   :  { %v1126_v61 = vadd.f32 %v1124_v56, %v1108_v39  ;;  %v1306_v39 = vld [vmem:[#allocation6 + $0x1f0] sm:$0xff]  ;;  %v1295_v56 = vld [vmem:[#allocation6 + $0x198] sm:$0xff] }
 0x212   :  { %v2584_v57 = vpop.eup %2583  ;;  %v2314_v42 = vcombine.low %v1302_v38, %v1306_v39  ;;  %v2315_v43 = vcombine.high %v1302_v38, %v1306_v39  ;;  %v2274_v38 = vcombine.low %v1262_v22, %v1266_v23 }
 0x213   :  { %v1125_v58 = vmul.f32 %v2584_v57, %v1123_v55  ;;  %v1298_v55 = vld [vmem:[#allocation6 + $0x1b0] sm:$0xff]  ;;  %v1299_v57 = vld [vmem:[#allocation6 + $0x1b8] sm:$0xff] }
 0x214   :  { %1756 = vmatprep.subr.bf16.mxu0 %v2315_v43  ;;  %v1246_v43 = vld [vmem:[#allocation6 + $0x10] sm:$0xff] }
 0x215   :  { %v1127_v62 = vadd.f32 %v1125_v58, %v1112_v49 }
 0x217   :  { %v1128_v63 = vpack.c.bf16 %v1127_v62, %v1126_v61  ;;  %v2307_v61 = vcombine.high %v1294_v53, %v1298_v55  ;;  %v2309_v62 = vcombine.high %v1295_v56, %v1299_v57 }
 0x219   :  { %2446 = vmatmul.mubr.bf16.vlgmr.msra.gmra.mxu1 %v1128_v63  ;;  %v1286_v63 = vld [vmem:[#allocation6 + $0x150] sm:$0xff] }
 0x21a   :  { %1714 = vmatpush1.bf16.msra.mxu1 %v2312_v6  ;;  %1745 = vmatprep.mubr.bf16.mxu1 %v2657_v15  ;;  %v2273_v6 = vcombine.high %v1261_v16, %v1265_v37  ;;  %v2293_v37 = vcombine.high %v1279_v11, %v1283_v12  ;;  %v1340_v11 = vsub.s32 7, %v2730_v33 }
 0x21b   :  { %1715 = vmatprep.subr.bf16.mxu1 %v2305_v0  ;;  %v1290_v0 = vld [vmem:[#allocation6 + $0x170] sm:$0xff] }
 0x21c   :  { %v2299_v7 = vcombine.high %v1286_v63, %v1290_v0 }
 0x21e   :  { %1716 = vmatpush1.bf16.msra.mxu1 %v2304_v4  ;;  %v2306_v4 = vcombine.low %v1294_v53, %v1298_v55 }
 0x21f   :  { %1717 = vmatprep.subr.bf16.mxu1 %v2297_v5  ;;  %v2308_v5 = vcombine.low %v1295_v56, %v1299_v57 }
 0x222   :  { %1718 = vmatpush1.bf16.msra.mxu1 %v2296_v9  ;;  %v1278_v9 = vld [vmem:[#allocation6 + $0x110] sm:$0xff] }
 0x223   :  { %1719 = vmatprep.subr.bf16.mxu1 %v2289_v10  ;;  %v1282_v10 = vld [vmem:[#allocation6 + $0x130] sm:$0xff] }
 0x224   :  { %v2291_v16 = vcombine.high %v1278_v9, %v1282_v10  ;;  %v2290_v19 = vcombine.low %v1278_v9, %v1282_v10  ;;  %v1336_v9 = vsub.s32 6, %v2730_v33  ;;  %v1332_v10 = vsub.s32 5, %v2730_v33 }
 0x226   :  { %1720 = vmatpush1.bf16.msra.mxu1 %v2288_v13  ;;  %v2298_v13 = vcombine.low %v1286_v63, %v1290_v0  ;;  %v1320_v63 = vsub.s32 2, %v2730_v33  ;;  %v1308_v0 = vld [vmem:[%s2928_s9] sm:$0xff] }
 0x227   :  { %1721 = vmatprep.subr.bf16.mxu1 %v2281_v14  ;;  %v2300_v14 = vcombine.low %v1287_v1, %v1291_v2  ;;  %v1317_v1 = vrot.slane %v1308_v0, %v989_v28  ;;  %v1313_v2 = vrot.slane %v1308_v0, %v985_v27 }
 0x22a   :  { %1722 = vmatpush1.bf16.msra.mxu1 %v2280_v3  ;;  %v1270_v3 = vld [vmem:[#allocation6 + $0xd0] sm:$0xff] }
 0x22b   :  { %1723 = vmatprep.subr.bf16.mxu1 %v2273_v6  ;;  %v1274_v6 = vld [vmem:[#allocation6 + $0xf0] sm:$0xff] }
 0x22c   :  { %v2283_v21 = vcombine.high %v1270_v3, %v1274_v6  ;;  %v2282_v26 = vcombine.low %v1270_v3, %v1274_v6  ;;  %v1333_v3 = vrot.slane %v1308_v0, %v1332_v10  ;;  %v1341_v6 = vrot.slane %v1308_v0, %v1340_v11 }
 0x22e   :  { %1724 = vmatpush1.bf16.msra.mxu1 %v2272_v17  ;;  %v1271_v17 = vld [vmem:[#allocation6 + $0xd8] sm:$0xff] }
 0x22f   :  { %1725 = vmatprep.subr.bf16.mxu1 %v2265_v25  ;;  %v1267_v25 = vld [vmem:[#allocation6 + $0xb8] sm:$0xff]  ;;  %v2284_v29 = vcombine.low %v1271_v17, %v1275_v18 }
 0x232   :  { %1726 = vmatpush1.bf16.msra.mxu1 %v2264_v24  ;;  %v1263_v24 = vld [vmem:[#allocation6 + $0x98] sm:$0xff] }
 0x233   :  { %1727 = vmatprep.subr.bf16.mxu1 %v2257_v36  ;;  %v2277_v31 = vcombine.high %v1263_v24, %v1267_v25  ;;  %v1259_v36 = vld [vmem:[#allocation6 + $0x78] sm:$0xff]  ;;  %v2276_v39 = vcombine.low %v1263_v24, %v1267_v25 }
 0x236   :  { %1728 = vmatpush1.bf16.msra.mxu1 %v2256_v35  ;;  %v1255_v35 = vld [vmem:[#allocation6 + $0x58] sm:$0xff] }
 0x237   :  { %1799 = vmatprep.subr.bf16.mxu1 %v2317_v46  ;;  %v1251_v46 = vld [vmem:[#allocation6 + $0x38] sm:$0xff] }
 0x2d9   :  { %v1234_v48 = vpop.f32.mrf.mxu1 }
 0x2da   :  { %v1235_v50 = vadd.f32 %v2245_v47, %v1234_v48  ;;  %v2268_v48 = vcombine.low %v1255_v35, %v1259_v36 }
 0x2db   :  { %v2447_v49 = vpop.f32.mrf.mxu1 }
 0x2dc   :  { %v1241_v58 = vmax.f32 %v1235_v50, 0.0  ;;  %v2259_v49 = vcombine.high %v1246_v43, %v1250_v44 }
 0x2dd   :  { %v1237_v51 = vpop.f32.mrf.mxu1 }
 0x2de   :  { %v1238_v52 = vadd.f32 %v2245_v47, %v1237_v51  ;;  %v2266_v47 = vcombine.low %v1254_v32, %v1258_v34  ;;  %v2258_v51 = vcombine.low %v1246_v43, %v1250_v44 }
 0x2df   :  { %v2448_v54 = vpop.f32.mrf.mxu1 }
 0x2e0   :  { %v1242_v59 = vmax.f32 %v1238_v52, 0.0 }
 0x2e2   :  { %v2889_v60 = vpack.c.bf16 %v1242_v59, %v1241_v58 }
 0x2e4   :  { %1703 = vmatmul.mubr.bf16.vlgmr.msra.gmra.mxu0 %v2889_v60  ;;  %1746 = vmatmul.mubr.bf16.vlgmr.msra.gmra.mxu1 %v2889_v60 }
 0x2e5   :  { %1757 = vmatpush1.bf16.msra.mxu0 %v2314_v42  ;;  %1800 = vmatpush1.bf16.msra.mxu1 %v2316_v45  ;;  %v2269_v42 = vcombine.high %v1255_v35, %v1259_v36  ;;  %v1247_v45 = vld [vmem:[#allocation6 + $0x18] sm:$0xff] }
 0x2e6   :  { %1758 = vmatprep.subr.bf16.mxu0 %v2307_v61  ;;  %1801 = vmatprep.subr.bf16.mxu1 %v2309_v62  ;;  %v2261_v50 = vcombine.high %v1247_v45, %v1251_v46  ;;  %v2260_v52 = vcombine.low %v1247_v45, %v1251_v46  ;;  %v1324_v62 = vsub.s32 3, %v2730_v33 }
 0x2e7   :  { %1788 = vmatprep.mubr.bf16.mxu0 %v2657_v15  ;;  %1831 = vmatprep.mubr.bf16.mxu1 %v2657_v15  ;;  %v2285_v15 = vcombine.high %v1271_v17, %v1275_v18 }
 0x2e9   :  { %1759 = vmatpush1.bf16.msra.mxu0 %v2306_v4  ;;  %1802 = vmatpush1.bf16.msra.mxu1 %v2308_v5  ;;  %v1321_v4 = vrot.slane %v1308_v0, %v1320_v63 }
 0x2ea   :  { %1760 = vmatprep.subr.bf16.mxu0 %v2299_v7  ;;  %1803 = vmatprep.subr.bf16.mxu1 %v2301_v8  ;;  %v1328_v8 = vsub.s32 4, %v2730_v33 }
 0x2ec   :  { %v1329_v28 = vrot.slane %v1308_v0, %v1328_v8 }
 0x2ed   :  { %1761 = vmatpush1.bf16.msra.mxu0 %v2298_v13  ;;  %1804 = vmatpush1.bf16.msra.mxu1 %v2300_v14 }
 0x2ee   :  { %1762 = vmatprep.subr.bf16.mxu0 %v2291_v16  ;;  %1805 = vmatprep.subr.bf16.mxu1 %v2293_v37  ;;  %v1337_v37 = vrot.slane %v1308_v0, %v1336_v9 }
 0x2f1   :  { %1763 = vmatpush1.bf16.msra.mxu0 %v2290_v19  ;;  %1806 = vmatpush1.bf16.msra.mxu1 %v2292_v20 }
 0x2f2   :  { %1764 = vmatprep.subr.bf16.mxu0 %v2283_v21  ;;  %1807 = vmatprep.subr.bf16.mxu1 %v2285_v15 }
 0x2f5   :  { %1765 = vmatpush1.bf16.msra.mxu0 %v2282_v26  ;;  %1808 = vmatpush1.bf16.msra.mxu1 %v2284_v29 }
 0x2f6   :  { %1766 = vmatprep.subr.bf16.mxu0 %v2275_v30  ;;  %1809 = vmatprep.subr.bf16.mxu1 %v2277_v31 }
 0x2f9   :  { %1767 = vmatpush1.bf16.msra.mxu0 %v2274_v38  ;;  %1810 = vmatpush1.bf16.msra.mxu1 %v2276_v39 }
 0x2fa   :  { %1768 = vmatprep.subr.bf16.mxu0 %v2267_v40  ;;  %1811 = vmatprep.subr.bf16.mxu1 %v2269_v42 }
 0x2fd   :  { %1769 = vmatpush1.bf16.msra.mxu0 %v2266_v47  ;;  %1812 = vmatpush1.bf16.msra.mxu1 %v2268_v48 }
 0x2fe   :  { %1770 = vmatprep.subr.bf16.mxu0 %v2259_v49  ;;  %1813 = vmatprep.subr.bf16.mxu1 %v2261_v50 }
 0x301   :  { %1771 = vmatpush1.bf16.msra.mxu0 %v2258_v51  ;;  %1814 = vmatpush1.bf16.msra.mxu1 %v2260_v52 }
 0x304   :  { %1789 = vmatmul.mubr.bf16.vlgmr.msra.gmra.mxu0 %v2889_v60  ;;  %1832 = vmatmul.mubr.bf16.vlgmr.msra.gmra.mxu1 %v2889_v60  ;;  %v1325_v60 = vrot.slane %v1308_v0, %v1324_v62 }
 0x3a4   :  { %v1704_v53 = vpop.f32.mrf.mxu0  ;;  %v1747_v54 = vpop.f32.mrf.mxu1 }
 0x3a5   :  { %v1705_v12 = vadd.f32 %v1704_v53, %v1313_v2  ;;  %v1748_v13 = vadd.f32 %v1747_v54, %v1321_v4 }
 0x3a6   :  { %v1706_v55 = vpop.f32.mrf.mxu0  ;;  %v1749_v56 = vpop.f32.mrf.mxu1 }
 0x3a7   :  { %v1707_v5 = vadd.f32 %v1706_v55, %v1317_v1  ;;  %v1750_v7 = vadd.f32 %v1749_v56, %v1325_v60 }
 0x3a8   :  { %v1708_v57 = vpop.f32.mrf.mxu0  ;;  %v1751_v58 = vpop.f32.mrf.mxu1 }
 0x3a9   :  { %v2318_v14 = vpack.c.bf16 %v1707_v5, %v1705_v12  ;;  %v2320_v16 = vpack.c.bf16 %v1750_v7, %v1748_v13 }
 0x3aa   :  { %v1710_v59 = vpop.f32.mrf.mxu0  ;;  %v1753_v61 = vpop.f32.mrf.mxu1 }
 0x3ab   :  { %v1872_v18 = vrot.slane %v2318_v14, %v2870_v41  ;;  %v1886_v19 = vrot.slane %v2320_v16, %v2870_v41 }
 0x3ad   :  { %v1922_v32 = vcombine.low %v1872_v18, %v1886_v19 }
 0x3af   :  { %v1936_v38 = vrot.slane %v1922_v32, %v2870_v41 }
 0x3c4   :  { %v1790_v27 = vpop.f32.mrf.mxu0  ;;  %v1833_v17 = vpop.f32.mrf.mxu1 }
 0x3c5   :  { %v1791_v15 = vadd.f32 %v1790_v27, %v1329_v28  ;;  %v1834_v22 = vadd.f32 %v1833_v17, %v1337_v37 }
 0x3c6   :  { %v1792_v20 = vpop.f32.mrf.mxu0  ;;  %v1835_v21 = vpop.f32.mrf.mxu1 }
 0x3c7   :  { %v1793_v23 = vadd.f32 %v1792_v20, %v1333_v3  ;;  %v1836_v33 = vadd.f32 %v1835_v21, %v1341_v6 }
 0x3c8   :  { %v1794_v24 = vpop.f32.mrf.mxu0  ;;  %v1837_v25 = vpop.f32.mrf.mxu1 }
 0x3c9   :  { %v2322_v26 = vpack.c.bf16 %v1793_v23, %v1791_v15  ;;  %v2324_v29 = vpack.c.bf16 %v1836_v33, %v1834_v22 }
 0x3ca   :  { %v1796_v30 = vpop.f32.mrf.mxu0  ;;  %v1839_v31 = vpop.f32.mrf.mxu1 }
 0x3cb   :  { %v1900_v34 = vrot.slane %v2322_v26, %v2870_v41  ;;  %v1914_v35 = vrot.slane %v2324_v29, %v2870_v41 }
 0x3cd   :  { %v1926_v36 = vcombine.low %v1900_v34, %v1914_v35 }
 0x3cf   :  { %v1964_v39 = vrot.slane %v1926_v36, %v2870_v41 }
 0x3d1   :  { %v1986_v40 = vcombine.low %v1936_v38, %v1964_v39 }
 0x3d3   :  { %2111 = vst [vmem:[%s2929_s10] sm:$0xff] %v1986_v40 }
 0x3d4   :  { %2154 = vsyncpa [#allocation3], 1 }
 0x3d5   :  { %2155 = vsyncpa [#allocation5], 1 }

</bundles_post_ra>
